<compile_context>
chip_gen: v7x
topology: tpu7x:2x2x1
jax: 0.10.0
libtpu: 0.0.40
codegen_flags: <defaults>
</compile_context>

<pallas_src>
import jax
import jax.numpy as jnp
from jax.experimental import pallas as pl
from jax.experimental.pallas import tpu as pltpu

N_CLASSES = 10
N_HIDDEN = 100
N_INPUT = 28 * 28  # 784

H_PAD = 128    # hidden dim padded to one full lane width
C_PAD = 128    # class dim padded to one full lane width (lane-dense stores)
MAX_TM = 2048  # batch tile; ~19 MB total VMEM double-buffered (see header)
VMEM_LIMIT_BYTES = 40 * 1024 * 1024  # explicit scope: > v5e 16 MiB default,
                                     # comfortably < v7x 64 MiB physical


def mlp_kernel(x_ref, w1_ref, b1_ref, w2_ref, b2_ref, o_ref):
    # linear1: [TM, F] @ [F, H_PAD] + [1, H_PAD], f32 accumulation on MXU
    h = jnp.dot(x_ref[...], w1_ref[...], preferred_element_type=jnp.float32)
    h = jnp.maximum(h + b1_ref[...], 0.0)          # ReLU (padded lanes stay 0)
    # linear2: [TM, H_PAD] @ [H_PAD, C_PAD] + [1, C_PAD]
    o = jnp.dot(h.astype(w2_ref.dtype), w2_ref[...],
                preferred_element_type=jnp.float32)
    o_ref[...] = (o + b2_ref[...]).astype(o_ref.dtype)


def prepare_params(w1, b1, w2, b2, dtype=jnp.float32):
    """One-time parameter prep (transpose + zero-pad to lane-aligned shapes).

    w1: [N_HIDDEN, N_INPUT]  (PyTorch nn.Linear layout)
    b1: [N_HIDDEN]
    w2: [N_CLASSES, N_HIDDEN]
    b2: [N_CLASSES]
    dtype: weight dtype.  jnp.bfloat16 is the v5e lever (halves the dominant
           x-stream bytes and restores single-pass MXU) but is tolerance-gated.
    """
    w1t = jnp.zeros((N_INPUT, H_PAD), dtype).at[:, :N_HIDDEN].set(
        w1.T.astype(dtype))
    b1p = jnp.zeros((1, H_PAD), jnp.float32).at[:, :N_HIDDEN].set(b1)
    w2t = jnp.zeros((H_PAD, C_PAD), dtype).at[:N_HIDDEN, :N_CLASSES].set(
        w2.T.astype(dtype))
    b2p = jnp.zeros((1, C_PAD), jnp.float32).at[:, :N_CLASSES].set(b2)
    return w1t, b1p, w2t, b2p


def _round_up(x, m):
    return ((x + m - 1) // m) * m


def _choose_tm(B):
    # Split into >= 2 blocks whenever the batch allows, so the "parallel"
    # axis shards across both TensorCores on v7x (no effect on v5e/v6e).
    tm = _round_up(pl.cdiv(max(B, 1), 2), 8)
    return max(8, min(MAX_TM, tm))


def linear_model2_forward(x, w1t, b1p, w2t, b2p, *, tm=None,
                          slice_output=True):
    """Forward pass of LinearModel2: relu(x @ W1^T + b1) @ W2^T + b2.

    x: [B, N_INPUT] float32.  Params must come from prepare_params().
    Returns [B, N_CLASSES] float32 (or the full [B, C_PAD] lane-dense slab
    when slice_output=False, for consumers that can fuse the slice).
    """
    B = x.shape[0]
    if x.dtype != w1t.dtype:
        x = x.astype(w1t.dtype)   # bf16 path only; no-op in the default f32 path
    if tm is None:
        tm = _choose_tm(B)
    tm = max(8, _round_up(tm, 8))             # sublane alignment for f32

    grid = (pl.cdiv(B, tm),)                  # ragged final block is fine:
                                              # OOB tail rows never escape.
    itemsize = jnp.dtype(x.dtype).itemsize
    cost = pl.CostEstimate(
        flops=2 * B * (N_INPUT * H_PAD + H_PAD * C_PAD),
        transcendentals=0,
        bytes_accessed=(B * N_INPUT * itemsize                # x stream
                        + (N_INPUT * H_PAD + H_PAD * C_PAD) * itemsize  # weights
                        + 2 * C_PAD * 4                       # biases
                        + B * C_PAD * 4),                     # output slab
    )
    out = pl.pallas_call(
        mlp_kernel,
        out_shape=jax.ShapeDtypeStruct((B, C_PAD), jnp.float32),
        grid=grid,
        in_specs=[
            pl.BlockSpec((tm, N_INPUT), lambda i: (i, 0)),       # streamed
            pl.BlockSpec((N_INPUT, H_PAD), lambda i: (0, 0)),    # resident
            pl.BlockSpec((1, H_PAD), lambda i: (0, 0)),          # resident
            pl.BlockSpec((H_PAD, C_PAD), lambda i: (0, 0)),      # resident
            pl.BlockSpec((1, C_PAD), lambda i: (0, 0)),          # resident
        ],
        out_specs=pl.BlockSpec((tm, C_PAD), lambda i: (i, 0)),
        compiler_params=pltpu.CompilerParams(
            dimension_semantics=("parallel",),
            vmem_limit_bytes=VMEM_LIMIT_BYTES),
        cost_estimate=cost,
    )(x, w1t, b1p, w2t, b2p)
    if slice_output:
        return out[:, :N_CLASSES]
    return out


if __name__ == "__main__":
    key = jax.random.PRNGKey(0)
    k_x, k_w1, k_b1, k_w2, k_b2, k_x2 = jax.random.split(key, 6)

    # Deterministic parameter init (uniform, PyTorch default Linear scale)
    bound1 = 1.0 / (N_INPUT ** 0.5)
    w1 = jax.random.uniform(k_w1, (N_HIDDEN, N_INPUT), jnp.float32, -bound1, bound1)
    b1 = jax.random.uniform(k_b1, (N_HIDDEN,), jnp.float32, -bound1, bound1)
    bound2 = 1.0 / (N_HIDDEN ** 0.5)
    w2 = jax.random.uniform(k_w2, (N_CLASSES, N_HIDDEN), jnp.float32, -bound2, bound2)
    b2 = jax.random.uniform(k_b2, (N_CLASSES,), jnp.float32, -bound2, bound2)

    # One-time parameter prep (transpose + lane padding), hoisted out of the
    # per-call path.  Default f32 weights to satisfy the strict tolerance.
    w1t, b1p, w2t, b2p = prepare_params(w1, b1, w2, b2)

    def ref_fn(xx):
        return jnp.maximum(xx @ w1.T + b1, 0.0) @ w2.T + b2

    # Small-batch check (single block, tm clamps to 8 sublanes).
    B = 8
    x = jax.random.normal(k_x, (B, N_INPUT), dtype=jnp.float32)
    out = jax.block_until_ready(linear_model2_forward(x, w1t, b1p, w2t, b2p))
    assert out.shape == (B, N_CLASSES)
    assert jnp.allclose(out, ref_fn(x), atol=1e-4, rtol=1e-4)

    # Grid + ragged-final-block check (B not a multiple of the tile;
    # no wrapper padding, last block is partial).
    B2 = 200
    x2 = jax.random.normal(k_x2, (B2, N_INPUT), dtype=jnp.float32)
    out2 = jax.block_until_ready(
        linear_model2_forward(x2, w1t, b1p, w2t, b2p, tm=64))
    assert out2.shape == (B2, N_CLASSES)
    assert jnp.allclose(out2, ref_fn(x2), atol=1e-4, rtol=1e-4)

    # Default tm heuristic check (>= 2 blocks for moderate B -> v7x megacore).
    out3 = jax.block_until_ready(linear_model2_forward(x2, w1t, b1p, w2t, b2p))
    assert out3.shape == (B2, N_CLASSES)
    assert jnp.allclose(out3, ref_fn(x2), atol=1e-4, rtol=1e-4)

    print("KERNEL_OK")
</pallas_src>

<mosaic_0001>
module attributes {stable_mosaic.version = 11 : i64} {
  func.func @mlp_kernel(%arg0: i32, %arg1: memref<8x784xf32, #tpu.memory_space<vmem>>, %arg2: memref<784x128xf32, #tpu.memory_space<vmem>>, %arg3: memref<1x128xf32, #tpu.memory_space<vmem>>, %arg4: memref<128x128xf32, #tpu.memory_space<vmem>>, %arg5: memref<1x128xf32, #tpu.memory_space<vmem>>, %arg6: memref<8x128xf32, #tpu.memory_space<vmem>>) attributes {dimension_semantics = [#tpu.dimension_semantics<parallel>], iteration_bounds = array<i64: 1>, scalar_prefetch = 0 : i64, scratch_operands = 0 : i64, tpu.core_type = #tpu.core_type<tc>, window_params = [{transform_indices = @transform_0, window_bounds = array<i64: 8, 784>}, {pipeline_mode = #tpu.pipeline_mode<synchronous>, transform_indices = @transform_1, window_bounds = array<i64: 784, 128>}, {pipeline_mode = #tpu.pipeline_mode<synchronous>, transform_indices = @transform_2, window_bounds = array<i64: 1, 128>}, {pipeline_mode = #tpu.pipeline_mode<synchronous>, transform_indices = @transform_3, window_bounds = array<i64: 128, 128>}, {pipeline_mode = #tpu.pipeline_mode<synchronous>, transform_indices = @transform_4, window_bounds = array<i64: 1, 128>}, {transform_indices = @transform_5, window_bounds = array<i64: 8, 128>}]} {
    %c0 = arith.constant 0 : index
    %c0_0 = arith.constant 0 : index
    %0 = vector.load %arg1[%c0, %c0_0] : memref<8x784xf32, #tpu.memory_space<vmem>>, vector<8x784xf32>
    %c0_1 = arith.constant 0 : index
    %c0_2 = arith.constant 0 : index
    %1 = vector.load %arg2[%c0_1, %c0_2] : memref<784x128xf32, #tpu.memory_space<vmem>>, vector<784x128xf32>
    %cst = arith.constant dense<0.000000e+00> : vector<8x128xf32>
    %2 = tpu.matmul %0, %1, %cst {dimension_numbers = #tpu.dot_dimension_numbers<[1], [0], [0], [1], [0, 0, 1, 1], [], []>} : vector<8x784xf32>, vector<784x128xf32>, vector<8x128xf32> -> vector<8x128xf32>
    %c0_3 = arith.constant 0 : index
    %c0_4 = arith.constant 0 : index
    %3 = vector.load %arg3[%c0_3, %c0_4] : memref<1x128xf32, #tpu.memory_space<vmem>>, vector<1x128xf32>
    %4 = vector.broadcast %3 : vector<1x128xf32> to vector<8x128xf32>
    %5 = arith.addf %2, %4 : vector<8x128xf32>
    %cst_5 = arith.constant 0.000000e+00 : f32
    %6 = vector.broadcast %cst_5 : f32 to vector<8x128xf32>
    %7 = arith.maximumf %5, %6 : vector<8x128xf32>
    %c0_6 = arith.constant 0 : index
    %c0_7 = arith.constant 0 : index
    %8 = vector.load %arg4[%c0_6, %c0_7] : memref<128x128xf32, #tpu.memory_space<vmem>>, vector<128x128xf32>
    %cst_8 = arith.constant dense<0.000000e+00> : vector<8x128xf32>
    %9 = tpu.matmul %7, %8, %cst_8 {dimension_numbers = #tpu.dot_dimension_numbers<[1], [0], [0], [1], [0, 0, 1, 1], [], []>} : vector<8x128xf32>, vector<128x128xf32>, vector<8x128xf32> -> vector<8x128xf32>
    %c0_9 = arith.constant 0 : index
    %c0_10 = arith.constant 0 : index
    %10 = vector.load %arg5[%c0_9, %c0_10] : memref<1x128xf32, #tpu.memory_space<vmem>>, vector<1x128xf32>
    %11 = vector.broadcast %10 : vector<1x128xf32> to vector<8x128xf32>
    %12 = arith.addf %9, %11 : vector<8x128xf32>
    %c0_11 = arith.constant 0 : index
    %c0_12 = arith.constant 0 : index
    %13 = vector.load %arg6[%c0_11, %c0_12] : memref<8x128xf32, #tpu.memory_space<vmem>>, vector<8x128xf32>
    tpu.vector_store %arg6[%c0_11, %c0_12], %12 {strides = array<i32>} : memref<8x128xf32, #tpu.memory_space<vmem>>, vector<8x128xf32>,
    return
  }
  func.func @transform_0(%arg0: i32) -> (i32, i32) {
    %c0_i32 = arith.constant 0 : i32
    %c0_i32_0 = arith.constant 0 : i32
    return %arg0, %c0_i32 : i32, i32
  }
  func.func @transform_1(%arg0: i32) -> (i32, i32) {
    %c0_i32 = arith.constant 0 : i32
    %c0_i32_0 = arith.constant 0 : i32
    %c0_i32_1 = arith.constant 0 : i32
    return %c0_i32, %c0_i32_0 : i32, i32
  }
  func.func @transform_2(%arg0: i32) -> (i32, i32) {
    %c0_i32 = arith.constant 0 : i32
    %c0_i32_0 = arith.constant 0 : i32
    %c0_i32_1 = arith.constant 0 : i32
    return %c0_i32, %c0_i32_0 : i32, i32
  }
  func.func @transform_3(%arg0: i32) -> (i32, i32) {
    %c0_i32 = arith.constant 0 : i32
    %c0_i32_0 = arith.constant 0 : i32
    %c0_i32_1 = arith.constant 0 : i32
    return %c0_i32, %c0_i32_0 : i32, i32
  }
  func.func @transform_4(%arg0: i32) -> (i32, i32) {
    %c0_i32 = arith.constant 0 : i32
    %c0_i32_0 = arith.constant 0 : i32
    %c0_i32_1 = arith.constant 0 : i32
    return %c0_i32, %c0_i32_0 : i32, i32
  }
  func.func @transform_5(%arg0: i32) -> (i32, i32) {
    %c0_i32 = arith.constant 0 : i32
    %c0_i32_0 = arith.constant 0 : i32
    return %arg0, %c0_i32 : i32, i32
  }
}

</mosaic_0001>

<bundles_post_ra>
// kernel: tpu_custom_call.1
= control target key start
LH: loop header
LB: loop body
LE: loop exit
PB: predicated region body
PF: predicated region fallthrough
CT: control target
= control target key end

     0   :  { %10 = vsyncpa [#allocation3], 0  ;;  %s1071_s0 = inlined_call_operand.hbm [shape: f32[8,784], index: 0, kind: input, shape index: {}]   ;;  %s1072_s1 = inlined_call_operand.hbm [shape: f32[784,128], index: 1, kind: input, shape index: {}]   ;;  %s1073_s2 = inlined_call_operand.vmem [shape: f32[1,128], index: 2, kind: input, shape index: {}]   ;;  %s1074_s3 = inlined_call_operand.hbm [shape: f32[128,128], index: 3, kind: input, shape index: {}]   ;;  %s1075_s4 = inlined_call_operand.vmem [shape: f32[1,128], index: 4, kind: input, shape index: {}]   ;;  %s1076_s5 = inlined_call_operand.hbm [shape: f32[8,128], index: 5, kind: output, shape index: {}]  }
   0x1   :  { %11 = vsyncpa [#allocation6], 0 }
   0x2   :  { %12 = vsyncpa [#allocation4], 0  ;;  %s963_s18 = smov [#allocation5]   ;;  %s869_s22 = scalar_lea.hbm %s1072_s1, 12544 }
   0x3   :  { %s28_s19 = sshll.u32 %s963_s18, 4  ;;  %p870_p0 = scmp.ne.s32.totalorder %s1072_s1, %s869_s22  ;;  %s29_s19 = int_to_ptr.vmem [resolvable:$true] %s28_s19 }
   0x4   :  { %p873_p1 = scmp.lt.u32.totalorder %s869_s22, %s1072_s1 }
   0x6   :  { %p875_p2 = pnand %p873_p1, %p870_p0 }
   0x8   :  { %878 = shalt.err (!%p875_p2)
}
   0x9   :  { %s879_s27 = scalar_lea.vmem %s29_s19, 12544  ;;  %p884_p4 = scmp.lt.s32.totalorder %s29_s19, %s29_s19 }
   0xa   :  { %p880_p3 = scmp.ne.s32.totalorder %s29_s19, %s879_s27  ;;  %p885_p5 = scmp.lt.s32.totalorder %s879_s27, %s879_s27 }
   0xc   :  { %p886_p6 = por %p885_p5, %p884_p4 }
   0xe   :  { %p887_p7 = pnand %p886_p6, %p880_p3 }
  0x10   :  { %890 = shalt.err (!%p887_p7)
}
  0x11   :  { %s964_s28 = smov 128   ;;  %s965_s29 = smov 8  }
  0x12   :  { %34 = dma.hbm_to_vmem [thread:$0]  %s1072_s1, 12544, %s29_s19, [#allocation6], %s964_s28, %s964_s28, %s965_s29  }
  0x13   :  { %s966_s7 = smov [#allocation2]   ;;  %s967_s9 = smov [#allocation7]  }
  0x14   :  { %s19_s8 = sshll.u32 %s966_s7, 4  ;;  %s42_s10 = sshll.u32 %s967_s9, 4  ;;  %s20_s8 = int_to_ptr.vmem [resolvable:$true] %s19_s8  ;;  %s43_s10 = int_to_ptr.vmem [resolvable:$true] %s42_s10 }
  0x15   :  { %s891_s13 = scalar_lea.hbm %s1071_s0, 896 }
  0x16   :  { %p892_p8 = scmp.ne.s32.totalorder %s1071_s0, %s891_s13  ;;  %p895_p9 = scmp.lt.u32.totalorder %s891_s13, %s1071_s0 }
  0x18   :  { %p897_p10 = pnand %p895_p9, %p892_p8 }
  0x1a   :  { %900 = shalt.err (!%p897_p10)
}
  0x1b   :  { %s901_s1 = scalar_lea.vmem %s20_s8, 896  ;;  %p906_p12 = scmp.lt.s32.totalorder %s20_s8, %s20_s8 }
  0x1c   :  { %p902_p11 = scmp.ne.s32.totalorder %s20_s8, %s901_s1  ;;  %p907_p13 = scmp.lt.s32.totalorder %s901_s1, %s901_s1 }
  0x1e   :  { %p908_p0 = por %p907_p13, %p906_p12 }
  0x20   :  { %p909_p1 = pnand %p908_p0, %p902_p11 }
  0x22   :  { %912 = shalt.err (!%p909_p1)
}
  0x23   :  { %22 = dma.hbm_to_vmem [thread:$0]  %s1071_s0, 896, %s20_s8, [#allocation3]  }
  0x24   :  { %s913_s22 = scalar_lea.hbm %s1074_s3, 2048 }
  0x25   :  { %p914_p2 = scmp.ne.s32.totalorder %s1074_s3, %s913_s22  ;;  %p917_p3 = scmp.lt.u32.totalorder %s913_s22, %s1074_s3 }
  0x27   :  { %p919_p4 = pnand %p917_p3, %p914_p2 }
  0x29   :  { %922 = shalt.err (!%p919_p4)
}
  0x2a   :  { %s923_s27 = scalar_lea.vmem %s43_s10, 2048  ;;  %p928_p6 = scmp.lt.s32.totalorder %s43_s10, %s43_s10 }
  0x2b   :  { %p924_p5 = scmp.ne.s32.totalorder %s43_s10, %s923_s27  ;;  %p929_p7 = scmp.lt.s32.totalorder %s923_s27, %s923_s27 }
  0x2d   :  { %p930_p8 = por %p929_p7, %p928_p6 }
  0x2f   :  { %p931_p9 = pnand %p930_p8, %p924_p5 }
  0x31   :  { %934 = shalt.err (!%p931_p9)
}
  0x32   :  { %48 = dma.hbm_to_vmem [thread:$0]  %s1074_s3, 2048, %s43_s10, [#allocation6], %s964_s28, %s964_s28, %s965_s29  }
  0x33   :  { %957 = dma.done.wait [#allocation3], 896  }
  0x34   :  { %958 = vsyncadd [#allocation3], 4294966400 }
  0x35   :  { %959 = dma.done.wait [#allocation6], 14592  }
  0x36   :  { %960 = vsyncadd [#allocation6], 4294952704  ;;  %v83_v0 = vld [vmem:[#allocation5 + $0x80] sm:$0xff]  ;;  %v84_v1 = vld [vmem:[#allocation5 + $0x88] sm:$0xff]  ;;  %vm969_vm0 = vmmov 0   ;;  %vm172_vm1 = vcmask 130048  }
  0x37   :  { %v67_v2 = vld [vmem:[#allocation5] sm:$0xff]  ;;  %v737_v3 = vpack.c.bf16 %v84_v1, %v83_v0  ;;  %v68_v4 = vld [vmem:[#allocation5 + $0x8] sm:$0xff]  ;;  %v85_v11 = vld [vmem:[#allocation5 + $0x90] sm:$0xff] }
  0x38   :  { %v115_v5 = vld [vmem:[#allocation5 + $0x180] sm:$0xff]  ;;  %v116_v6 = vld [vmem:[#allocation5 + $0x188] sm:$0xff]  ;;  %v739_v7 = vpack.c.bf16 %v68_v4, %v67_v2  ;;  %v86_v13 = vld [vmem:[#allocation5 + $0x98] sm:$0xff] }
  0x39   :  { %v769_v8 = vpack.c.bf16 %v116_v6, %v115_v5  ;;  %v99_v9 = vld [vmem:[#allocation5 + $0x100] sm:$0xff]  ;;  %v100_v10 = vld [vmem:[#allocation5 + $0x108] sm:$0xff]  ;;  %738 = vmatprep.subr.bf16.mxu0 %v737_v3  ;;  %v69_v14 = vld [vmem:[#allocation5 + $0x10] sm:$0xff]  ;;  %v741_v16 = vpack.c.bf16 %v86_v13, %v85_v11 }
  0x3a   :  { %v771_v12 = vpack.c.bf16 %v100_v10, %v99_v9  ;;  %v70_v15 = vld [vmem:[#allocation5 + $0x18] sm:$0xff]  ;;  %740 = vmatpush3.bf16.msra.mxu0 %v739_v7  ;;  %v117_v18 = vld [vmem:[#allocation5 + $0x190] sm:$0xff]  ;;  %v87_v23 = vld [vmem:[#allocation5 + $0xa0] sm:$0xff] }
  0x3b   :  { %770 = vmatprep.subr.bf16.mxu1 %v769_v8  ;;  %v743_v17 = vpack.c.bf16 %v70_v15, %v69_v14  ;;  %v118_v19 = vld [vmem:[#allocation5 + $0x198] sm:$0xff]  ;;  %v101_v20 = vld [vmem:[#allocation5 + $0x110] sm:$0xff]  ;;  %v88_v24 = vld [vmem:[#allocation5 + $0xa8] sm:$0xff]  ;;  %742 = vmatprep.subr.bf16.mxu0 %v741_v16 }
  0x3c   :  { %772 = vmatpush3.bf16.msra.mxu1 %v771_v12  ;;  %v773_v21 = vpack.c.bf16 %v118_v19, %v117_v18  ;;  %v102_v22 = vld [vmem:[#allocation5 + $0x118] sm:$0xff]  ;;  %v745_v26 = vpack.c.bf16 %v88_v24, %v87_v23  ;;  %v71_v27 = vld [vmem:[#allocation5 + $0x20] sm:$0xff]  ;;  %v72_v28 = vld [vmem:[#allocation5 + $0x28] sm:$0xff] }
  0x3d   :  { %v775_v25 = vpack.c.bf16 %v102_v22, %v101_v20  ;;  %v119_v29 = vld [vmem:[#allocation5 + $0x1a0] sm:$0xff]  ;;  %v120_v30 = vld [vmem:[#allocation5 + $0x1a8] sm:$0xff]  ;;  %v747_v33 = vpack.c.bf16 %v72_v28, %v71_v27  ;;  %v89_v35 = vld [vmem:[#allocation5 + $0xb0] sm:$0xff] }
  0x3e   :  { %774 = vmatprep.subr.bf16.mxu1 %v773_v21  ;;  %v103_v31 = vld [vmem:[#allocation5 + $0x120] sm:$0xff]  ;;  %v104_v32 = vld [vmem:[#allocation5 + $0x128] sm:$0xff]  ;;  %744 = vmatpush3.bf16.msra.mxu0 %v743_v17  ;;  %v777_v34 = vpack.c.bf16 %v120_v30, %v119_v29  ;;  %v90_v36 = vld [vmem:[#allocation5 + $0xb8] sm:$0xff] }
  0x3f   :  { %v73_v37 = vld [vmem:[#allocation5 + $0x30] sm:$0xff]  ;;  %746 = vmatprep.subr.bf16.mxu0 %v745_v26  ;;  %v779_v38 = vpack.c.bf16 %v104_v32, %v103_v31  ;;  %v749_v39 = vpack.c.bf16 %v90_v36, %v89_v35  ;;  %v74_v40 = vld [vmem:[#allocation5 + $0x38] sm:$0xff]  ;;  %v91_v46 = vld [vmem:[#allocation5 + $0xc0] sm:$0xff] }
  0x40   :  { %776 = vmatpush3.bf16.msra.mxu1 %v775_v25  ;;  %v121_v41 = vld [vmem:[#allocation5 + $0x1b0] sm:$0xff]  ;;  %v122_v42 = vld [vmem:[#allocation5 + $0x1b8] sm:$0xff]  ;;  %v92_v47 = vld [vmem:[#allocation5 + $0xc8] sm:$0xff]  ;;  %v751_v48 = vpack.c.bf16 %v74_v40, %v73_v37 }
  0x41   :  { %778 = vmatprep.subr.bf16.mxu1 %v777_v34  ;;  %v781_v43 = vpack.c.bf16 %v122_v42, %v121_v41  ;;  %v105_v44 = vld [vmem:[#allocation5 + $0x130] sm:$0xff]  ;;  %v106_v45 = vld [vmem:[#allocation5 + $0x138] sm:$0xff]  ;;  %v123_v49 = vld [vmem:[#allocation5 + $0x1c0] sm:$0xff]  ;;  %v753_v52 = vpack.c.bf16 %v92_v47, %v91_v46 }
  0x42   :  { %748 = vmatpush3.bf16.msra.mxu0 %v747_v33  ;;  %v124_v50 = vld [vmem:[#allocation5 + $0x1c8] sm:$0xff]  ;;  %v783_v51 = vpack.c.bf16 %v106_v45, %v105_v44  ;;  %v75_v53 = vld [vmem:[#allocation5 + $0x40] sm:$0xff]  ;;  %v93_v58 = vld [vmem:[#allocation5 + $0xd0] sm:$0xff] }
  0x43   :  { %750 = vmatprep.subr.bf16.mxu0 %v749_v39  ;;  %v76_v54 = vld [vmem:[#allocation5 + $0x48] sm:$0xff]  ;;  %v107_v55 = vld [vmem:[#allocation5 + $0x140] sm:$0xff]  ;;  %v785_v56 = vpack.c.bf16 %v124_v50, %v123_v49  ;;  %v94_v59 = vld [vmem:[#allocation5 + $0xd8] sm:$0xff]  ;;  %v968_v50 = vmov 0.0|0.0  }
  0x44   :  { %780 = vmatpush3.bf16.msra.mxu1 %v779_v38  ;;  %v108_v57 = vld [vmem:[#allocation5 + $0x148] sm:$0xff]  ;;  %v125_v60 = vld [vmem:[#allocation5 + $0x1d0] sm:$0xff]  ;;  %v126_v61 = vld [vmem:[#allocation5 + $0x1d8] sm:$0xff]  ;;  %v755_v62 = vpack.c.bf16 %v76_v54, %v75_v53  ;;  %v757_v0 = vpack.c.bf16 %v94_v59, %v93_v58 }
  0x45   :  { %782 = vmatprep.subr.bf16.mxu1 %v781_v43  ;;  %v787_v63 = vpack.c.bf16 %v108_v57, %v107_v55  ;;  %v77_v1 = vld [vmem:[#allocation5 + $0x50] sm:$0xff]  ;;  %v78_v2 = vld [vmem:[#allocation5 + $0x58] sm:$0xff]  ;;  %v789_v4 = vpack.c.bf16 %v126_v61, %v125_v60  ;;  %v95_v6 = vld [vmem:[#allocation5 + $0xe0] sm:$0xff]  ;;  %v970_v60 = vmov 0.0  }
  0x46   :  { %752 = vmatpush3.bf16.msra.mxu0 %v751_v48  ;;  %v109_v3 = vld [vmem:[#allocation5 + $0x150] sm:$0xff]  ;;  %v110_v5 = vld [vmem:[#allocation5 + $0x158] sm:$0xff]  ;;  %v96_v7 = vld [vmem:[#allocation5 + $0xe8] sm:$0xff]  ;;  %v759_v10 = vpack.c.bf16 %v78_v2, %v77_v1 }
  0x47   :  { %754 = vmatprep.subr.bf16.mxu0 %v753_v52  ;;  %v127_v8 = vld [vmem:[#allocation5 + $0x1e0] sm:$0xff]  ;;  %v128_v9 = vld [vmem:[#allocation5 + $0x1e8] sm:$0xff]  ;;  %v61_v12 = vld [vmem:[#allocation2 + $0x8] sm:$0xff]  ;;  %v791_v13 = vpack.c.bf16 %v110_v5, %v109_v3  ;;  %v761_v14 = vpack.c.bf16 %v96_v7, %v95_v6 }
  0x48   :  { %784 = vmatpush3.bf16.msra.mxu1 %v783_v51  ;;  %v79_v11 = vld [vmem:[#allocation5 + $0x60] sm:$0xff]  ;;  %v80_v15 = vld [vmem:[#allocation5 + $0x68] sm:$0xff]  ;;  %v793_v18 = vpack.c.bf16 %v128_v9, %v127_v8  ;;  %v97_v19 = vld [vmem:[#allocation5 + $0xf0] sm:$0xff]  ;;  %240 = vmatprep.mubr.f32.mxu0 %v61_v12 }
  0x49   :  { %786 = vmatprep.subr.bf16.mxu1 %v785_v56  ;;  %v111_v16 = vld [vmem:[#allocation5 + $0x160] sm:$0xff]  ;;  %v112_v17 = vld [vmem:[#allocation5 + $0x168] sm:$0xff]  ;;  %v98_v20 = vld [vmem:[#allocation5 + $0xf8] sm:$0xff]  ;;  %v763_v24 = vpack.c.bf16 %v80_v15, %v79_v11 }
  0x4a   :  { %756 = vmatpush3.bf16.msra.mxu0 %v755_v62  ;;  %v63_v21 = vld [vmem:[#allocation2 + $0x18] sm:$0xff]  ;;  %v129_v22 = vld [vmem:[#allocation5 + $0x1f0] sm:$0xff]  ;;  %v130_v23 = vld [vmem:[#allocation5 + $0x1f8] sm:$0xff]  ;;  %v795_v25 = vpack.c.bf16 %v112_v17, %v111_v16  ;;  %v765_v26 = vpack.c.bf16 %v98_v20, %v97_v19 }
  0x4b   :  { %758 = vmatprep.subr.bf16.mxu0 %v757_v0  ;;  %310 = vmatprep.mubr.f32.mxu1 %v63_v21  ;;  %v81_v27 = vld [vmem:[#allocation5 + $0x70] sm:$0xff]  ;;  %v82_v28 = vld [vmem:[#allocation5 + $0x78] sm:$0xff]  ;;  %v797_v30 = vpack.c.bf16 %v130_v23, %v129_v22  ;;  %v147_v32 = vld [vmem:[#allocation5 + $0x280] sm:$0xff] }
  0x4c   :  { %788 = vmatpush3.bf16.msra.mxu1 %v787_v63  ;;  %v113_v29 = vld [vmem:[#allocation5 + $0x170] sm:$0xff]  ;;  %v114_v31 = vld [vmem:[#allocation5 + $0x178] sm:$0xff]  ;;  %v148_v33 = vld [vmem:[#allocation5 + $0x288] sm:$0xff]  ;;  %v767_v34 = vpack.c.bf16 %v82_v28, %v81_v27 }
  0x4d   :  { %790 = vmatprep.subr.bf16.mxu1 %v789_v4  ;;  %v799_v35 = vpack.c.bf16 %v114_v31, %v113_v29  ;;  %v801_v36 = vpack.c.bf16 %v148_v33, %v147_v32  ;;  %v131_v37 = vld [vmem:[#allocation5 + $0x200] sm:$0xff]  ;;  %v132_v38 = vld [vmem:[#allocation5 + $0x208] sm:$0xff]  ;;  %v149_v39 = vld [vmem:[#allocation5 + $0x290] sm:$0xff] }
  0x4e   :  { %760 = vmatpush3.bf16.msra.mxu0 %v759_v10  ;;  %v150_v40 = vld [vmem:[#allocation5 + $0x298] sm:$0xff]  ;;  %v60_v41 = vld [vmem:[#allocation2] sm:$0xff]  ;;  %v803_v42 = vpack.c.bf16 %v132_v38, %v131_v37  ;;  %v133_v44 = vld [vmem:[#allocation5 + $0x210] sm:$0xff] }
  0x4f   :  { %762 = vmatprep.subr.bf16.mxu0 %v761_v14  ;;  %v62_v43 = vld [vmem:[#allocation2 + $0x10] sm:$0xff]  ;;  %v805_v45 = vpack.c.bf16 %v150_v40, %v149_v39  ;;  %v151_v47 = vld [vmem:[#allocation5 + $0x2a0] sm:$0xff]  ;;  %v152_v48 = vld [vmem:[#allocation5 + $0x2a8] sm:$0xff] }
  0x50   :  { %792 = vmatpush3.bf16.msra.mxu1 %v791_v13  ;;  %v134_v46 = vld [vmem:[#allocation5 + $0x218] sm:$0xff]  ;;  %v65_v49 = vld [vmem:[#allocation2 + $0x28] sm:$0xff]  ;;  %v163_v51 = vld [vmem:[#allocation5 + $0x300] sm:$0xff]  ;;  %v809_v55 = vpack.c.bf16 %v152_v48, %v151_v47 }
  0x51   :  { %794 = vmatprep.subr.bf16.mxu1 %v793_v18  ;;  %v164_v52 = vld [vmem:[#allocation5 + $0x308] sm:$0xff]  ;;  %v807_v54 = vpack.c.bf16 %v134_v46, %v133_v44  ;;  %v135_v56 = vld [vmem:[#allocation5 + $0x220] sm:$0xff]  ;;  %v153_v58 = vld [vmem:[#allocation5 + $0x2b0] sm:$0xff] }
  0x52   :  { %764 = vmatpush3.bf16.msra.mxu0 %v763_v24  ;;  %v834_v53 = vpack.c.bf16 %v164_v52, %v163_v51  ;;  %v136_v57 = vld [vmem:[#allocation5 + $0x228] sm:$0xff]  ;;  %v154_v59 = vld [vmem:[#allocation5 + $0x2b8] sm:$0xff]  ;;  %v137_v0 = vld [vmem:[#allocation5 + $0x230] sm:$0xff] }
  0x53   :  { %766 = vmatprep.subr.bf16.mxu0 %v765_v26  ;;  %v66_v61 = vld [vmem:[#allocation2 + $0x30] sm:$0xff]  ;;  %v811_v62 = vpack.c.bf16 %v136_v57, %v135_v56  ;;  %v813_v63 = vpack.c.bf16 %v154_v59, %v153_v58  ;;  %v155_v2 = vld [vmem:[#allocation5 + $0x2c0] sm:$0xff]  ;;  %v156_v3 = vld [vmem:[#allocation5 + $0x2c8] sm:$0xff] }
  0x54   :  { %796 = vmatpush3.bf16.msra.mxu1 %v795_v25  ;;  %v138_v1 = vld [vmem:[#allocation5 + $0x238] sm:$0xff]  ;;  %v817_v5 = vpack.c.bf16 %v156_v3, %v155_v2  ;;  %v139_v6 = vld [vmem:[#allocation5 + $0x240] sm:$0xff]  ;;  %v140_v7 = vld [vmem:[#allocation5 + $0x248] sm:$0xff] }
  0x55   :  { %798 = vmatprep.subr.bf16.mxu1 %v797_v30  ;;  %v815_v4 = vpack.c.bf16 %v138_v1, %v137_v0  ;;  %v157_v8 = vld [vmem:[#allocation5 + $0x2d0] sm:$0xff]  ;;  %v158_v9 = vld [vmem:[#allocation5 + $0x2d8] sm:$0xff]  ;;  %v819_v10 = vpack.c.bf16 %v140_v7, %v139_v6  ;;  %v159_v14 = vld [vmem:[#allocation5 + $0x2e0] sm:$0xff] }
  0x56   :  { %768 = vmatpush3.bf16.msra.mxu0 %v767_v34  ;;  %v821_v11 = vpack.c.bf16 %v158_v9, %v157_v8  ;;  %v141_v12 = vld [vmem:[#allocation5 + $0x250] sm:$0xff]  ;;  %v142_v13 = vld [vmem:[#allocation5 + $0x258] sm:$0xff]  ;;  %v160_v15 = vld [vmem:[#allocation5 + $0x2e8] sm:$0xff] }
  0x57   :  { %802 = vmatprep.subr.bf16.mxu0 %v801_v36  ;;  %v823_v16 = vpack.c.bf16 %v142_v13, %v141_v12  ;;  %v825_v17 = vpack.c.bf16 %v160_v15, %v159_v14  ;;  %v143_v18 = vld [vmem:[#allocation5 + $0x260] sm:$0xff]  ;;  %v144_v19 = vld [vmem:[#allocation5 + $0x268] sm:$0xff]  ;;  %v161_v20 = vld [vmem:[#allocation5 + $0x2f0] sm:$0xff] }
  0x58   :  { %800 = vmatpush3.bf16.msra.mxu1 %v799_v35  ;;  %v162_v21 = vld [vmem:[#allocation5 + $0x2f8] sm:$0xff]  ;;  %v827_v22 = vpack.c.bf16 %v144_v19, %v143_v18  ;;  %v145_v24 = vld [vmem:[#allocation5 + $0x270] sm:$0xff]  ;;  %v64_v27 = vld [vmem:[#allocation2 + $0x20] sm:$0xff] }
  0x59   :  { %833 = vmatprep.subr.bf16.mxu1 %v968_v50  ;;  %241 = vmatmul.mubr.f32.vlgmr.msra.gmra.mrb[0].mxu0 %v60_v41  ;;  %v829_v23 = vpack.c.bf16 %v162_v21, %v161_v20  ;;  %v146_v25 = vld [vmem:[#allocation5 + $0x278] sm:$0xff]  ;;  %v457_v28 = vld [vmem:[#allocation7] sm:$0xff]  ;;  %v459_v30 = vld [vmem:[#allocation7 + $0x10] sm:$0xff] }
  0x5a   :  { %804 = vmatpush3.bf16.msra.mxu0 %v803_v42  ;;  %380 = vmatprep.mubr.f32.mxu0 %v65_v49  ;;  %v831_v26 = vpack.c.bf16 %v146_v25, %v145_v24  ;;  %v458_v29 = vld [vmem:[#allocation7 + $0x8] sm:$0xff]  ;;  %v460_v32 = vld [vmem:[#allocation7 + $0x18] sm:$0xff]  ;;  %v461_v34 = vld [vmem:[#allocation7 + $0x20] sm:$0xff] }
  0x5b   :  { %311 = vmatmul.mubr.f32.vlgmr.msra.gmra.mrb[0].mxu1 %v62_v43  ;;  %806 = vmatprep.subr.bf16.mxu0 %v805_v45  ;;  %v837_v31 = vpack.c.bf16 %v458_v29, %v457_v28  ;;  %v840_v33 = vpack.c.bf16 %v460_v32, %v459_v30  ;;  %v462_v35 = vld [vmem:[#allocation7 + $0x28] sm:$0xff]  ;;  %v463_v37 = vld [vmem:[#allocation7 + $0x30] sm:$0xff]  ;;  %v464_v38 = vld [vmem:[#allocation7 + $0x38] sm:$0xff] }
  0x5c   :  { %835 = vmatpush3.bf16.msra.mxu1 %v834_v53  ;;  %699 = vmatprep.mubr.msk.f32.mxu1 %vm969_vm0, %v970_v60  ;;  %v843_v36 = vpack.c.bf16 %v462_v35, %v461_v34  ;;  %v846_v39 = vpack.c.bf16 %v464_v38, %v463_v37  ;;  %v465_v40 = vld [vmem:[#allocation7 + $0x40] sm:$0xff]  ;;  %v466_v41 = vld [vmem:[#allocation7 + $0x48] sm:$0xff]  ;;  %v467_v43 = vld [vmem:[#allocation7 + $0x50] sm:$0xff] }
  0x5d   :  { %836 = vmatprep.subr.bf16.mxu1 %v968_v50  ;;  %v849_v42 = vpack.c.bf16 %v466_v41, %v465_v40  ;;  %v468_v44 = vld [vmem:[#allocation7 + $0x58] sm:$0xff]  ;;  %v469_v46 = vld [vmem:[#allocation7 + $0x60] sm:$0xff]  ;;  %v470_v47 = vld [vmem:[#allocation7 + $0x68] sm:$0xff] }
  0x5e   :  { %808 = vmatpush3.bf16.msra.mxu0 %v807_v54  ;;  %v852_v45 = vpack.c.bf16 %v468_v44, %v467_v43  ;;  %v855_v48 = vpack.c.bf16 %v470_v47, %v469_v46  ;;  %v471_v49 = vld [vmem:[#allocation7 + $0x70] sm:$0xff]  ;;  %v472_v51 = vld [vmem:[#allocation7 + $0x78] sm:$0xff] }
  0x5f   :  { %810 = vmatprep.subr.bf16.mxu0 %v809_v55  ;;  %700 = vmatmul.mubr.msk.f32.vlgmr.msra.gmra.mrb[2].mxu1 %vm172_vm1, %v66_v61  ;;  %v858_v52 = vpack.c.bf16 %v472_v51, %v471_v49  ;;  %v567_v54 = vld [vmem:[%s1073_s2] ss:$0 sm:$0xff]  ;;  %s971_s2 = smov [#allocation8]  }
  0x60   :  { %734 = vmatprep.mubr.msk.f32.mxu1 %vm969_vm0, %v970_v60  ;;  %838 = vmatpush3.bf16.msra.mxu1 %v837_v31  ;;  %s557_s7 = sshll.u32 %s971_s2, 4  ;;  %s558_s7 = int_to_ptr.vmem [resolvable:$true] %s557_s7 }
  0x61   :  { %839 = vmatprep.subr.bf16.mxu1 %v968_v50  ;;  %s935_s8 = scalar_lea.vmem %s558_s7, 128  ;;  %p940_p11 = scmp.lt.s32.totalorder %s558_s7, %s558_s7 }
  0x62   :  { %812 = vmatpush3.bf16.msra.mxu0 %v811_v62  ;;  %p936_p10 = scmp.ne.s32.totalorder %s558_s7, %s935_s8  ;;  %p941_p12 = scmp.lt.s32.totalorder %s935_s8, %s935_s8 }
  0x63   :  { %814 = vmatprep.subr.bf16.mxu0 %v813_v63 }
  0x64   :  { %841 = vmatpush3.bf16.msra.mxu1 %v840_v33  ;;  %p942_p13 = por %p941_p12, %p940_p11 }
  0x65   :  { %842 = vmatprep.subr.bf16.mxu1 %v968_v50 }
  0x66   :  { %816 = vmatpush3.bf16.msra.mxu0 %v815_v4  ;;  %p943_p0 = pnand %p942_p13, %p936_p10 }
  0x67   :  { %818 = vmatprep.subr.bf16.mxu0 %v817_v5  ;;  %v569_v5 = vld [vmem:[%s1075_s4] ss:$0 sm:$0xff] }
  0x68   :  { %844 = vmatpush3.bf16.msra.mxu1 %v843_v36 }
  0x69   :  { %845 = vmatprep.subr.bf16.mxu1 %v968_v50 }
  0x6a   :  { %820 = vmatpush3.bf16.msra.mxu0 %v819_v10 }
  0x6b   :  { %822 = vmatprep.subr.bf16.mxu0 %v821_v11 }
  0x6c   :  { %847 = vmatpush3.bf16.msra.mxu1 %v846_v39 }
  0x6d   :  { %848 = vmatprep.subr.bf16.mxu1 %v968_v50 }
  0x6e   :  { %824 = vmatpush3.bf16.msra.mxu0 %v823_v16 }
  0x6f   :  { %826 = vmatprep.subr.bf16.mxu0 %v825_v17 }
  0x70   :  { %850 = vmatpush3.bf16.msra.mxu1 %v849_v42 }
  0x71   :  { %851 = vmatprep.subr.bf16.mxu1 %v968_v50 }
  0x72   :  { %828 = vmatpush3.bf16.msra.mxu0 %v827_v22 }
  0x73   :  { %830 = vmatprep.subr.bf16.mxu0 %v829_v23 }
  0x74   :  { %853 = vmatpush3.bf16.msra.mxu1 %v852_v45 }
  0x75   :  { %854 = vmatprep.subr.bf16.mxu1 %v968_v50 }
  0x76   :  { %832 = vmatpush3.bf16.msra.mxu0 %v831_v26 }
  0x78   :  { %856 = vmatpush3.bf16.msra.mxu1 %v855_v48 }
  0x79   :  { %381 = vmatmul.mubr.f32.vlgmr.msra.gmra.mrb[2].mxu0 %v64_v27  ;;  %857 = vmatprep.subr.bf16.mxu1 %v968_v50 }
  0x7c   :  { %859 = vmatpush3.bf16.msra.mxu1 %v858_v52 }
 0x12c   :  { %v602_v53 = vpop.f32.mrb[0].mxu0 }
 0x12d   :  { %v603_v55 = vpop.f32.mrb[1].mxu0 }
 0x12e   :  { %v637_v56 = vpop.f32.mrb[0].mxu1  ;;  %v604_v57 = vadd.f32 %v603_v55, %v602_v53 }
 0x12f   :  { %v638_v58 = vpop.f32.mrb[1].mxu1 }
 0x130   :  { %v639_v59 = vadd.f32 %v638_v58, %v637_v56  ;;  %v243_v60 = vadd.f32 %v604_v57, %v567_v54 }
 0x132   :  { %v313_v61 = vadd.f32 %v639_v59, %v243_v60  ;;  %v452_v62 = vpop.f32.mrb[2].mxu1 }
 0x133   :  { %v701_v63 = vpop.f32.mrb[3].mxu1 }
 0x14c   :  { %v672_v0 = vpop.f32.mrb[2].mxu0 }
 0x14d   :  { %v673_v50 = vpop.f32.mrb[3].mxu0 }
 0x14e   :  { %v674_v1 = vadd.f32 %v673_v50, %v672_v0 }
 0x150   :  { %v383_v2 = vadd.f32 %v674_v1, %v313_v61 }
 0x152   :  { %v453_v3 = vadd.f32 %v452_v62, %v383_v2 }
 0x154   :  { %v456_v4 = vmax.f32 %v453_v3, 0.0 }
 0x156   :  { %735 = vmatmul.mubr.f32.vlgmr.msra.gmra.mrb[4].mxu1 %v456_v4 }
 0x229   :  { %v546_v6 = vpop.f32.mrb[4].mxu1 }
 0x22a   :  { %v547_v7 = vadd.f32 %v569_v5, %v546_v6  ;;  %v736_v8 = vpop.f32.mrb[5].mxu1 }
 0x22c   :  { %550 = vst [vmem:[#allocation8] sm:$0xff] %v547_v7 }
 0x22d   :  { %946 = shalt.err (!%p943_p0)
}
 0x22e   :  { %s947_s11 = scalar_lea.hbm %s1076_s5, 128 }
 0x22f   :  { %p948_p1 = scmp.ne.s32.totalorder %s1076_s5, %s947_s11  ;;  %p951_p2 = scmp.lt.u32.totalorder %s947_s11, %s1076_s5 }
 0x231   :  { %p953_p3 = pnand %p951_p2, %p948_p1 }
 0x233   :  { %956 = shalt.err (!%p953_p3)
}
 0x234   :  { %560 = dma.vmem_to_hbm [thread:$0]  %s558_s7, 128, %s1076_s5, [#allocation4]  }
 0x235   :  { %961 = dma.done.wait [#allocation4], 128  }
 0x236   :  { %962 = vsyncadd [#allocation4], 4294967168 }
 0x237   :  { %564 = vsyncpa [#allocation3], 1 }
 0x238   :  { %565 = vsyncpa [#allocation6], 1 }
 0x239   :  { %566 = vsyncpa [#allocation4], 1 }

</bundles_post_ra>
